<compile_context>
chip_gen: v6e
topology: v6e:2x2x1
jax: 0.10.0
libtpu: 0.0.40
codegen_flags: <defaults>
</compile_context>

<pallas_src>
import functools

import jax
import jax.numpy as jnp
from jax.experimental import pallas as pl
from jax.experimental.pallas import tpu as pltpu


def _round_up(n, m):
    return ((n + m - 1) // m) * m


def policy_kernel(x_ref,
                  w1_ref, b1_ref,
                  w2_ref, b2_ref,
                  w3_ref, b3_ref,
                  w4_ref, b4_ref,
                  o_ref, *, action_bound):
    # bf16 operands feed the MXU; f32 accumulation + f32 elementwise math.
    h = jnp.dot(x_ref[...].astype(jnp.bfloat16), w1_ref[...],
                preferred_element_type=jnp.float32)
    h = jnp.maximum(h + b1_ref[...], 0.0)

    h = jnp.dot(h.astype(jnp.bfloat16), w2_ref[...],
                preferred_element_type=jnp.float32)
    h = jnp.maximum(h + b2_ref[...], 0.0)

    h = jnp.dot(h.astype(jnp.bfloat16), w3_ref[...],
                preferred_element_type=jnp.float32)
    h = jnp.maximum(h + b3_ref[...], 0.0)

    h = jnp.dot(h.astype(jnp.bfloat16), w4_ref[...],
                preferred_element_type=jnp.float32)
    h = h + b4_ref[...]

    # Policy head: tanh squashing scaled by action_bound.
    o_ref[...] = (jnp.tanh(h) * action_bound).astype(o_ref.dtype)


def policy_forward(x, params, output_dim, action_bound=3.0, max_batch_tile=2048):
    """params: (w1,b1,w2,b2,w3,b3,w4,b4); weights bf16 (in,out), biases f32 (1,out)."""
    w1, b1, w2, b2, w3, b3, w4, b4 = params
    B, in_dim = x.shape
    out_dim = w4.shape[1]
    assert out_dim == output_dim

    # Balanced batch tiling: bound padding to < 8 rows per tile instead of up
    # to a whole tile, and keep tiles large enough to amortize per-step cost.
    num_tiles = max(pl.cdiv(B, max_batch_tile), 1)
    # Prefer >= 2 grid steps once the batch is non-trivial so the "parallel"
    # batch axis can actually be sharded across v7x's two TensorCores.
    if B >= 64:
        num_tiles = max(num_tiles, 2)
    TB = _round_up(pl.cdiv(B, num_tiles), 8)
    Bp = TB * num_tiles
    if Bp != B:
        x = jnp.pad(x, ((0, Bp - B), (0, 0)))
    grid = (num_tiles,)

    def resident(arr):  # whole array in VMEM, same block for every grid step
        return pl.BlockSpec(arr.shape, lambda i: (0, 0))

    out = pl.pallas_call(
        functools.partial(policy_kernel, action_bound=float(action_bound)),
        out_shape=jax.ShapeDtypeStruct((Bp, out_dim), jnp.float32),
        grid=grid,
        in_specs=[
            pl.BlockSpec((TB, in_dim), lambda i: (i, 0)),
            resident(w1), resident(b1),
            resident(w2), resident(b2),
            resident(w3), resident(b3),
            resident(w4), resident(b4),
        ],
        # Last dim equals the full array dim (output_dim), so the narrow block
        # is legal; unpadded output cuts HBM writeback vs. the 128-lane pad.
        out_specs=pl.BlockSpec((TB, out_dim), lambda i: (i, 0)),
        compiler_params=pltpu.CompilerParams(
            dimension_semantics=("parallel",)),
    )(x, w1, b1, w2, b2, w3, b3, w4, b4)

    return out[:B, :]


def init_params(key, input_dim, output_dim, hidden_size):
    """Deterministic init mirroring nn.Linear default uniform(-1/sqrt(fan_in), +).
    Weights stored transposed (in, out) in bf16; biases f32 (1, out).
    No output padding: the last layer keeps its true width."""
    h2 = hidden_size // 2
    dims = [(input_dim, hidden_size), (hidden_size, h2), (h2, h2), (h2, output_dim)]
    params = []
    for fan_in, fan_out in dims:
        key, kw, kb = jax.random.split(key, 3)
        bound = float(fan_in) ** -0.5
        w = jax.random.uniform(kw, (fan_in, fan_out), jnp.float32, -bound, bound)
        b = jax.random.uniform(kb, (1, fan_out), jnp.float32, -bound, bound)
        params += [w.astype(jnp.bfloat16), b]
    return tuple(params)


if __name__ == "__main__":
    # Small shapes consistent with the Policy module:
    # batch=8, state_dim=16, action_dim=4, hidden=32, action_bound=3.
    B, STATE_DIM, ACTION_DIM, HIDDEN, ACTION_BOUND = 8, 16, 4, 32, 3.0

    key = jax.random.PRNGKey(0)
    key, kx = jax.random.split(key)
    x = jax.random.normal(kx, (B, STATE_DIM), jnp.float32)
    params = init_params(key, STATE_DIM, ACTION_DIM, HIDDEN)

    out = policy_forward(x, params, ACTION_DIM, ACTION_BOUND)
    jax.block_until_ready(out)

    # Plain-JAX reference with the identical dtype pipeline.
    w1, b1, w2, b2, w3, b3, w4, b4 = params
    h = jnp.maximum(jnp.dot(x.astype(jnp.bfloat16), w1,
                            preferred_element_type=jnp.float32) + b1, 0.0)
    h = jnp.maximum(jnp.dot(h.astype(jnp.bfloat16), w2,
                            preferred_element_type=jnp.float32) + b2, 0.0)
    h = jnp.maximum(jnp.dot(h.astype(jnp.bfloat16), w3,
                            preferred_element_type=jnp.float32) + b3, 0.0)
    h = jnp.dot(h.astype(jnp.bfloat16), w4,
                preferred_element_type=jnp.float32) + b4
    ref = jnp.tanh(h) * ACTION_BOUND

    assert out.shape == (B, ACTION_DIM)
    assert jnp.allclose(out, ref, atol=1e-3, rtol=1e-3), \
        float(jnp.max(jnp.abs(out - ref)))

    # Also exercise a larger, non-divisible batch to cover the balanced
    # multi-tile path (>= 2 grid steps, padded rows sliced off).
    key, kx2 = jax.random.split(key)
    B2 = 600
    x2 = jax.random.normal(kx2, (B2, STATE_DIM), jnp.float32)
    out2 = policy_forward(x2, params, ACTION_DIM, ACTION_BOUND)
    jax.block_until_ready(out2)
    h = jnp.maximum(jnp.dot(x2.astype(jnp.bfloat16), w1,
                            preferred_element_type=jnp.float32) + b1, 0.0)
    h = jnp.maximum(jnp.dot(h.astype(jnp.bfloat16), w2,
                            preferred_element_type=jnp.float32) + b2, 0.0)
    h = jnp.maximum(jnp.dot(h.astype(jnp.bfloat16), w3,
                            preferred_element_type=jnp.float32) + b3, 0.0)
    h = jnp.dot(h.astype(jnp.bfloat16), w4,
                preferred_element_type=jnp.float32) + b4
    ref2 = jnp.tanh(h) * ACTION_BOUND
    assert out2.shape == (B2, ACTION_DIM)
    assert jnp.allclose(out2, ref2, atol=1e-3, rtol=1e-3), \
        float(jnp.max(jnp.abs(out2 - ref2)))

    print("KERNEL_OK")
</pallas_src>

<mosaic_0001>
module attributes {stable_mosaic.version = 11 : i64} {
  func.func @policy_kernel(%arg0: i32, %arg1: memref<8x16xf32, #tpu.memory_space<vmem>>, %arg2: memref<16x32xbf16, #tpu.memory_space<vmem>>, %arg3: memref<1x32xf32, #tpu.memory_space<vmem>>, %arg4: memref<32x16xbf16, #tpu.memory_space<vmem>>, %arg5: memref<1x16xf32, #tpu.memory_space<vmem>>, %arg6: memref<16x16xbf16, #tpu.memory_space<vmem>>, %arg7: memref<1x16xf32, #tpu.memory_space<vmem>>, %arg8: memref<16x4xbf16, #tpu.memory_space<vmem>>, %arg9: memref<1x4xf32, #tpu.memory_space<vmem>>, %arg10: memref<8x4xf32, #tpu.memory_space<vmem>>) attributes {dimension_semantics = [#tpu.dimension_semantics<parallel>], iteration_bounds = array<i64: 1>, scalar_prefetch = 0 : i64, scratch_operands = 0 : i64, tpu.core_type = #tpu.core_type<tc>, window_params = [{transform_indices = @transform_0, window_bounds = array<i64: 8, 16>}, {pipeline_mode = #tpu.pipeline_mode<synchronous>, transform_indices = @transform_1, window_bounds = array<i64: 16, 32>}, {pipeline_mode = #tpu.pipeline_mode<synchronous>, transform_indices = @transform_2, window_bounds = array<i64: 1, 32>}, {pipeline_mode = #tpu.pipeline_mode<synchronous>, transform_indices = @transform_3, window_bounds = array<i64: 32, 16>}, {pipeline_mode = #tpu.pipeline_mode<synchronous>, transform_indices = @transform_4, window_bounds = array<i64: 1, 16>}, {pipeline_mode = #tpu.pipeline_mode<synchronous>, transform_indices = @transform_5, window_bounds = array<i64: 16, 16>}, {pipeline_mode = #tpu.pipeline_mode<synchronous>, transform_indices = @transform_6, window_bounds = array<i64: 1, 16>}, {pipeline_mode = #tpu.pipeline_mode<synchronous>, transform_indices = @transform_7, window_bounds = array<i64: 16, 4>}, {pipeline_mode = #tpu.pipeline_mode<synchronous>, transform_indices = @transform_8, window_bounds = array<i64: 1, 4>}, {transform_indices = @transform_9, window_bounds = array<i64: 8, 4>}]} {
    %c0 = arith.constant 0 : index
    %c0_0 = arith.constant 0 : index
    %0 = vector.load %arg1[%c0, %c0_0] : memref<8x16xf32, #tpu.memory_space<vmem>>, vector<8x16xf32>
    %1 = arith.truncf %0 : vector<8x16xf32> to vector<8x16xbf16>
    %c0_1 = arith.constant 0 : index
    %c0_2 = arith.constant 0 : index
    %2 = vector.load %arg2[%c0_1, %c0_2] : memref<16x32xbf16, #tpu.memory_space<vmem>>, vector<16x32xbf16>
    %cst = arith.constant dense<0.000000e+00> : vector<8x32xf32>
    %3 = tpu.matmul %1, %2, %cst {dimension_numbers = #tpu.dot_dimension_numbers<[1], [0], [0], [1], [0, 0, 1, 1], [], []>} : vector<8x16xbf16>, vector<16x32xbf16>, vector<8x32xf32> -> vector<8x32xf32>
    %c0_3 = arith.constant 0 : index
    %c0_4 = arith.constant 0 : index
    %4 = vector.load %arg3[%c0_3, %c0_4] : memref<1x32xf32, #tpu.memory_space<vmem>>, vector<1x32xf32>
    %5 = vector.broadcast %4 : vector<1x32xf32> to vector<8x32xf32>
    %6 = arith.addf %3, %5 : vector<8x32xf32>
    %cst_5 = arith.constant 0.000000e+00 : f32
    %7 = vector.broadcast %cst_5 : f32 to vector<8x32xf32>
    %8 = arith.maximumf %6, %7 : vector<8x32xf32>
    %9 = arith.truncf %8 : vector<8x32xf32> to vector<8x32xbf16>
    %c0_6 = arith.constant 0 : index
    %c0_7 = arith.constant 0 : index
    %10 = vector.load %arg4[%c0_6, %c0_7] : memref<32x16xbf16, #tpu.memory_space<vmem>>, vector<32x16xbf16>
    %cst_8 = arith.constant dense<0.000000e+00> : vector<8x16xf32>
    %11 = tpu.matmul %9, %10, %cst_8 {dimension_numbers = #tpu.dot_dimension_numbers<[1], [0], [0], [1], [0, 0, 1, 1], [], []>} : vector<8x32xbf16>, vector<32x16xbf16>, vector<8x16xf32> -> vector<8x16xf32>
    %c0_9 = arith.constant 0 : index
    %c0_10 = arith.constant 0 : index
    %12 = vector.load %arg5[%c0_9, %c0_10] : memref<1x16xf32, #tpu.memory_space<vmem>>, vector<1x16xf32>
    %13 = vector.broadcast %12 : vector<1x16xf32> to vector<8x16xf32>
    %14 = arith.addf %11, %13 : vector<8x16xf32>
    %cst_11 = arith.constant 0.000000e+00 : f32
    %15 = vector.broadcast %cst_11 : f32 to vector<8x16xf32>
    %16 = arith.maximumf %14, %15 : vector<8x16xf32>
    %17 = arith.truncf %16 : vector<8x16xf32> to vector<8x16xbf16>
    %c0_12 = arith.constant 0 : index
    %c0_13 = arith.constant 0 : index
    %18 = vector.load %arg6[%c0_12, %c0_13] : memref<16x16xbf16, #tpu.memory_space<vmem>>, vector<16x16xbf16>
    %cst_14 = arith.constant dense<0.000000e+00> : vector<8x16xf32>
    %19 = tpu.matmul %17, %18, %cst_14 {dimension_numbers = #tpu.dot_dimension_numbers<[1], [0], [0], [1], [0, 0, 1, 1], [], []>} : vector<8x16xbf16>, vector<16x16xbf16>, vector<8x16xf32> -> vector<8x16xf32>
    %c0_15 = arith.constant 0 : index
    %c0_16 = arith.constant 0 : index
    %20 = vector.load %arg7[%c0_15, %c0_16] : memref<1x16xf32, #tpu.memory_space<vmem>>, vector<1x16xf32>
    %21 = vector.broadcast %20 : vector<1x16xf32> to vector<8x16xf32>
    %22 = arith.addf %19, %21 : vector<8x16xf32>
    %cst_17 = arith.constant 0.000000e+00 : f32
    %23 = vector.broadcast %cst_17 : f32 to vector<8x16xf32>
    %24 = arith.maximumf %22, %23 : vector<8x16xf32>
    %25 = arith.truncf %24 : vector<8x16xf32> to vector<8x16xbf16>
    %c0_18 = arith.constant 0 : index
    %c0_19 = arith.constant 0 : index
    %26 = vector.load %arg8[%c0_18, %c0_19] : memref<16x4xbf16, #tpu.memory_space<vmem>>, vector<16x4xbf16>
    %cst_20 = arith.constant dense<0.000000e+00> : vector<8x4xf32>
    %27 = tpu.matmul %25, %26, %cst_20 {dimension_numbers = #tpu.dot_dimension_numbers<[1], [0], [0], [1], [0, 0, 1, 1], [], []>} : vector<8x16xbf16>, vector<16x4xbf16>, vector<8x4xf32> -> vector<8x4xf32>
    %c0_21 = arith.constant 0 : index
    %c0_22 = arith.constant 0 : index
    %28 = vector.load %arg9[%c0_21, %c0_22] : memref<1x4xf32, #tpu.memory_space<vmem>>, vector<1x4xf32>
    %29 = vector.broadcast %28 : vector<1x4xf32> to vector<8x4xf32>
    %30 = arith.addf %27, %29 : vector<8x4xf32>
    %31 = math.tanh %30 : vector<8x4xf32>
    %cst_23 = arith.constant 3.000000e+00 : f32
    %32 = vector.broadcast %cst_23 : f32 to vector<8x4xf32>
    %33 = arith.mulf %31, %32 : vector<8x4xf32>
    %c0_24 = arith.constant 0 : index
    %c0_25 = arith.constant 0 : index
    %34 = vector.load %arg10[%c0_24, %c0_25] : memref<8x4xf32, #tpu.memory_space<vmem>>, vector<8x4xf32>
    tpu.vector_store %arg10[%c0_24, %c0_25], %33 {strides = array<i32>} : memref<8x4xf32, #tpu.memory_space<vmem>>, vector<8x4xf32>,
    return
  }
  func.func @transform_0(%arg0: i32) -> (i32, i32) {
    %c0_i32 = arith.constant 0 : i32
    %c0_i32_0 = arith.constant 0 : i32
    return %arg0, %c0_i32 : i32, i32
  }
  func.func @transform_1(%arg0: i32) -> (i32, i32) {
    %c0_i32 = arith.constant 0 : i32
    %c0_i32_0 = arith.constant 0 : i32
    %c0_i32_1 = arith.constant 0 : i32
    return %c0_i32, %c0_i32_0 : i32, i32
  }
  func.func @transform_2(%arg0: i32) -> (i32, i32) {
    %c0_i32 = arith.constant 0 : i32
    %c0_i32_0 = arith.constant 0 : i32
    %c0_i32_1 = arith.constant 0 : i32
    return %c0_i32, %c0_i32_0 : i32, i32
  }
  func.func @transform_3(%arg0: i32) -> (i32, i32) {
    %c0_i32 = arith.constant 0 : i32
    %c0_i32_0 = arith.constant 0 : i32
    %c0_i32_1 = arith.constant 0 : i32
    return %c0_i32, %c0_i32_0 : i32, i32
  }
  func.func @transform_4(%arg0: i32) -> (i32, i32) {
    %c0_i32 = arith.constant 0 : i32
    %c0_i32_0 = arith.constant 0 : i32
    %c0_i32_1 = arith.constant 0 : i32
    return %c0_i32, %c0_i32_0 : i32, i32
  }
  func.func @transform_5(%arg0: i32) -> (i32, i32) {
    %c0_i32 = arith.constant 0 : i32
    %c0_i32_0 = arith.constant 0 : i32
    %c0_i32_1 = arith.constant 0 : i32
    return %c0_i32, %c0_i32_0 : i32, i32
  }
  func.func @transform_6(%arg0: i32) -> (i32, i32) {
    %c0_i32 = arith.constant 0 : i32
    %c0_i32_0 = arith.constant 0 : i32
    %c0_i32_1 = arith.constant 0 : i32
    return %c0_i32, %c0_i32_0 : i32, i32
  }
  func.func @transform_7(%arg0: i32) -> (i32, i32) {
    %c0_i32 = arith.constant 0 : i32
    %c0_i32_0 = arith.constant 0 : i32
    %c0_i32_1 = arith.constant 0 : i32
    return %c0_i32, %c0_i32_0 : i32, i32
  }
  func.func @transform_8(%arg0: i32) -> (i32, i32) {
    %c0_i32 = arith.constant 0 : i32
    %c0_i32_0 = arith.constant 0 : i32
    %c0_i32_1 = arith.constant 0 : i32
    return %c0_i32, %c0_i32_0 : i32, i32
  }
  func.func @transform_9(%arg0: i32) -> (i32, i32) {
    %c0_i32 = arith.constant 0 : i32
    %c0_i32_0 = arith.constant 0 : i32
    return %arg0, %c0_i32 : i32, i32
  }
}

</mosaic_0001>

<bundles_post_ra>
// kernel: tpu_custom_call.1
= control target key start
LH: loop header
LB: loop body
LE: loop exit
PB: predicated region body
PF: predicated region fallthrough
CT: control target
= control target key end

     0   :  { %v348_v0 = vmov 0.0   ;;  %vm349_vm0 = vmmov 0   ;;  %vm50_vm1 = vcmask 130048   ;;  %vm119_vm2 = vcmask 261120   ;;  %s440_s1 = inlined_call_operand.vmem [shape: bf16[16,32], index: 1, kind: input, shape index: {}]   ;;  %s441_s0 = inlined_call_operand.vmem [shape: f32[8,16], index: 0, kind: input, shape index: {}]   ;;  %s442_s3 = inlined_call_operand.vmem [shape: bf16[32,16], index: 3, kind: input, shape index: {}]   ;;  %s443_s5 = inlined_call_operand.vmem [shape: bf16[16,16], index: 5, kind: input, shape index: {}]   ;;  %s444_s2 = inlined_call_operand.vmem [shape: f32[1,32], index: 2, kind: input, shape index: {}]   ;;  %s445_s7 = inlined_call_operand.vmem [shape: bf16[16,4], index: 7, kind: input, shape index: {}]   ;;  %s446_s4 = inlined_call_operand.vmem [shape: f32[1,16], index: 4, kind: input, shape index: {}]   ;;  %s447_s6 = inlined_call_operand.vmem [shape: f32[1,16], index: 6, kind: input, shape index: {}]   ;;  %s448_s8 = inlined_call_operand.vmem [shape: f32[1,4], index: 8, kind: input, shape index: {}]   ;;  %s449_s9 = inlined_call_operand.vmem [shape: f32[8,4], index: 9, kind: output, shape index: {}]  }
   0x1   :  { %313 = vmatprep.subr.bf16.mxu0 %v348_v0  ;;  %v341_v1 = vld [vmem:[%s440_s1] sm:$0xff]   ;;  %315 = vmatprep.mubr.msk.bf16.mxu0 %vm349_vm0, %v348_v0  ;;  %v342_v4 = vld [vmem:[%s442_s3 + $0x8] sm:$0xff]   ;;  %vm285_vm3 = vcmask 31744  }
   0x2   :  { %v33_v2 = vld [vmem:[%s441_s0] sm:$0xff]  ;;  %319 = vmatprep.subr.bf16.mxu1 %v348_v0  ;;  %323 = vmatprep.mubr.msk.bf16.mxu1 %vm349_vm0, %v348_v0 }
   0x3   :  { %314 = vmatpush3.bf16.msra.mxu0 %v341_v1  ;;  %v34_v3 = vpack.c.bf16 %v33_v2, %v33_v2  ;;  %320 = vmatpush3.bf16.msra.mxu1 %v342_v4  ;;  %v343_v5 = vld [vmem:[%s442_s3] sm:$0xff]  }
   0x4   :  { %327 = vmatprep.subr.bf16.mxu0 %v348_v0  ;;  %321 = vmatprep.subr.bf16.mxu1 %v348_v0  ;;  %v344_v6 = vld [vmem:[%s443_s5] sm:$0xff]  }
   0x5   :  { %v291_v7 = vld [vmem:[%s444_s2] ss:$0 sm:$0xff] }
   0x6   :  { %316 = vmatmul.mubr.msk.bf16.vlgmr.msra.gmra.mxu0 %vm50_vm1, %v34_v3  ;;  %v345_v15 = vld [vmem:[%s445_s7] sm:$0xff]  }
   0x7   :  { %329 = vmatprep.mubr.msk.bf16.mxu0 %vm349_vm0, %v348_v0  ;;  %322 = vmatpush3.bf16.msra.mxu1 %v343_v5  ;;  %v294_v16 = vld [vmem:[%s446_s4] ss:$0 sm:$0xff] }
   0x8   :  { %333 = vmatprep.subr.bf16.mxu1 %v348_v0  ;;  %328 = vmatpush3.bf16.msra.mxu0 %v344_v6  ;;  %v298_v24 = vld [vmem:[%s447_s6] ss:$0 sm:$0xff] }
   0x9   :  { %v301_v32 = vld [vmem:[%s448_s8] ss:$0 sm:$0xff] }
  0xc6   :  { %v88_v8 = vpop.f32.mrf.mxu0 }
  0xc7   :  { %v89_v9 = vadd.f32 %v291_v7, %v88_v8 }
  0xc8   :  { %v317_v10 = vpop.f32.mrf.mxu0 }
  0xc9   :  { %v94_v11 = vmax.f32 %v89_v9, 0.0 }
  0xca   :  { %v91_v12 = vpop.f32.mrf.mxu0 }
  0xcb   :  { %v95_v13 = vpack.c.bf16 %v94_v11, %v94_v11 }
  0xcc   :  { %v318_v14 = vpop.f32.mrf.mxu0 }
  0xcd   :  { %324 = vmatmul.mubr.msk.bf16.vlgmr.msra.gmra.mxu1 %vm119_vm2, %v95_v13 }
  0xce   :  { %335 = vmatprep.mubr.msk.bf16.mxu1 %vm349_vm0, %v348_v0  ;;  %334 = vmatpush3.bf16.msra.mxu1 %v345_v15 }
 0x18d   :  { %v157_v17 = vpop.f32.mrf.mxu1 }
 0x18e   :  { %v158_v18 = vadd.f32 %v294_v16, %v157_v17 }
 0x18f   :  { %v325_v19 = vpop.f32.mrf.mxu1 }
 0x190   :  { %v163_v20 = vmax.f32 %v158_v18, 0.0 }
 0x191   :  { %v160_v21 = vpop.f32.mrf.mxu1 }
 0x192   :  { %v164_v22 = vpack.c.bf16 %v163_v20, %v163_v20 }
 0x193   :  { %v326_v23 = vpop.f32.mrf.mxu1 }
 0x194   :  { %330 = vmatmul.mubr.msk.bf16.vlgmr.msra.gmra.mxu0 %vm50_vm1, %v164_v22 }
 0x254   :  { %v217_v25 = vpop.f32.mrf.mxu0 }
 0x255   :  { %v218_v26 = vadd.f32 %v298_v24, %v217_v25 }
 0x256   :  { %v331_v27 = vpop.f32.mrf.mxu0 }
 0x257   :  { %v223_v28 = vmax.f32 %v218_v26, 0.0 }
 0x258   :  { %v220_v29 = vpop.f32.mrf.mxu0 }
 0x259   :  { %v224_v30 = vpack.c.bf16 %v223_v28, %v223_v28 }
 0x25a   :  { %v332_v31 = vpop.f32.mrf.mxu0 }
 0x25b   :  { %336 = vmatmul.mubr.msk.bf16.vlgmr.msra.gmra.mxu1 %vm50_vm1, %v224_v30 }
 0x31b   :  { %v277_v33 = vpop.f32.mrf.mxu1 }
 0x31c   :  { %v278_v34 = vadd.f32 %v301_v32, %v277_v33 }
 0x31d   :  { %v337_v35 = vpop.f32.mrf.mxu1 }
 0x31e   :  { %346 = vtanh.f32 %v278_v34 }
 0x31f   :  { %v280_v36 = vpop.f32.mrf.mxu1 }
 0x321   :  { %v338_v37 = vpop.f32.mrf.mxu1 }
 0x32b   :  { %v347_v38 = vpop.eup %346 }
 0x32c   :  { %v284_v39 = vmul.f32 3.0, %v347_v38 }
 0x32e   :  { %286 = vst.msk [vmem:[%s449_s9] sm:$0xff] %vm285_vm3, %v284_v39 }

</bundles_post_ra>
